<compile_context>
chip_gen: v7x
topology: tpu7x:2x2x1
jax: 0.10.0
libtpu: 0.0.40
codegen_flags: <defaults>
</compile_context>

<pallas_src>
import jax
import jax.numpy as jnp
import numpy as np
from jax.experimental import pallas as pl
from jax.experimental.pallas import tpu as pltpu

_MIB = 1024 * 1024


def _cdiv(a, b):
    return (a + b - 1) // b


def _round_up(n, m):
    return _cdiv(n, m) * m


def sccrt_kernel(x_ref,
                 w1_ref, b1_ref,   # encoder: input  -> middle
                 w2_ref, b2_ref,   # encoder: middle -> hidden
                 w3_ref, b3_ref,   # decoder: hidden -> middle
                 w4_ref, b4_ref,   # decoder: middle -> input
                 out_ref, recon_ref):
    cdt = w1_ref.dtype                 # MXU input dtype (bf16 or f32)
    # Cast x in-kernel (free on the VPU) instead of materializing a bf16 copy
    # of x in HBM from the wrapper.
    x = x_ref[...].astype(cdt)

    # ---- encoder ----  (MXU inputs in cdt, f32 accumulation, f32 epilogue)
    h1 = jnp.dot(x, w1_ref[...], preferred_element_type=jnp.float32) + b1_ref[...]
    h1 = jnp.maximum(h1, 0.0).astype(cdt)
    z = jnp.dot(h1, w2_ref[...], preferred_element_type=jnp.float32) + b2_ref[...]
    out_ref[...] = z.astype(out_ref.dtype)

    # ---- decoder ----
    h2 = jnp.dot(z.astype(cdt), w3_ref[...],
                 preferred_element_type=jnp.float32) + b3_ref[...]
    h2 = jnp.maximum(h2, 0.0).astype(cdt)
    recon = jnp.dot(h2, w4_ref[...], preferred_element_type=jnp.float32) + b4_ref[...]
    recon_ref[...] = recon.astype(recon_ref.dtype)


def prepare_params(params, compute_dtype=jnp.bfloat16):
    """One-time conversion of weights to the MXU compute dtype (biases stay f32)."""
    cdt = jnp.dtype(compute_dtype)
    return tuple((jnp.asarray(w, cdt), jnp.asarray(b, jnp.float32))
                 for (w, b) in params)


def _tpu_vmem_capacity_bytes():
    try:
        return int(pltpu.get_tpu_info().vmem_capacity_bytes)
    except Exception:
        return 64 * _MIB   # conservative fallback (v7x per-TensorCore VMEM)


def sccrt_forward(x, params, *, tb=None, out_dtype=None,
                  single_buffer_weights=False):
    """scCRT forward pass.  Returns (output, recon).

    `params` should come from prepare_params(); weight dtype selects the MXU
    input precision.  Outputs default to the same dtype as the weights
    (bf16 fast path / f32 exact path); accumulation is always f32.
    """
    (w1, b1), (w2, b2), (w3, b3), (w4, b4) = params
    B, input_size = x.shape
    middle_size = w1.shape[1]
    hidden_size = w2.shape[1]

    cdt = jnp.dtype(w1.dtype)                                   # MXU dtype
    odt = jnp.dtype(out_dtype) if out_dtype is not None else cdt

    # Sublane (second-to-last dim) alignment for the batch tile.
    any_bf16 = (cdt == jnp.bfloat16) or (odt == jnp.bfloat16)
    sub = 16 if any_bf16 else 8

    # --- device-aware VMEM budget -----------------------------------------
    vmem_cap = _tpu_vmem_capacity_bytes()
    small_vmem = vmem_cap <= 80 * _MIB            # v7x-like: 64 MiB/TC, 2 TCs
    if small_vmem:
        vmem_cap_limit = max(32 * _MIB, vmem_cap - 8 * _MIB)    # ~56 MiB on v7x
    else:
        vmem_cap_limit = min(100 * _MIB, vmem_cap - 8 * _MIB)   # ~100 MiB on v5e/v6e

    # --- batch tile selection ----------------------------------------------
    if tb is None:
        tb_cap = 256 if small_vmem else 1024      # bigger tiles on 128-MiB chips
        tb = min(_round_up(B, sub), tb_cap)
        # v7x has 2 TensorCores: make sure the "parallel" batch axis has at
        # least 2 grid steps so one core doesn't idle.
        if small_vmem and B >= 2 * sub and _cdiv(B, tb) < 2:
            tb = _round_up(_cdiv(B, 2), sub)
    else:
        tb = _round_up(max(1, min(tb, B)), sub)

    # --- VMEM accounting (no blanket margins; count buffers as allocated) ---
    wbytes = sum(w.size * w.dtype.itemsize for w in (w1, w2, w3, w4))
    bbytes = sum(b.size * b.dtype.itemsize for b in (b1, b2, b3, b4))
    wfac = 1 if single_buffer_weights else 2      # default pipeline keeps 2 bufs

    def vmem_need(t):
        x_tile = t * input_size * x.dtype.itemsize
        out_tiles = t * (hidden_size + input_size) * odt.itemsize
        interm = t * (2 * middle_size + hidden_size + input_size) * 4  # f32 temps
        return wfac * (wbytes + bbytes) + 2 * (x_tile + out_tiles) + interm

    while vmem_need(tb) > vmem_cap_limit and tb >= 2 * sub:
        tb = _round_up(tb // 2, sub)

    vmem_limit = int(min(max(vmem_need(tb) + 4 * _MIB, 32 * _MIB), vmem_cap_limit))

    # --- grid / padding ------------------------------------------------------
    num_tiles = _cdiv(B, tb)
    B_pad = num_tiles * tb
    xp = x if B_pad == B else jnp.pad(x, ((0, B_pad - B), (0, 0)))

    # Grid-invariant weight/bias specs: constant index_map keeps them resident.
    # With single_buffer_weights, also request a single pipeline buffer
    # (halves resident weight VMEM; matters on v7x at real gene counts).
    def resident(shape):
        if single_buffer_weights:
            return pl.BlockSpec(shape, lambda i: (0, 0),
                                pipeline_mode=pl.Buffered(1))
        return pl.BlockSpec(shape, lambda i: (0, 0))

    out_shapes = (
        jax.ShapeDtypeStruct((B_pad, hidden_size), odt),
        jax.ShapeDtypeStruct((B_pad, input_size), odt),
    )

    # Advisory cost estimate for XLA's scheduler.
    flops = 2 * B_pad * (input_size * middle_size + middle_size * hidden_size
                         + hidden_size * middle_size + middle_size * input_size)
    bytes_accessed = (B_pad * input_size * x.dtype.itemsize
                      + wbytes + bbytes
                      + B_pad * (hidden_size + input_size) * odt.itemsize)
    cost = pl.CostEstimate(flops=flops, transcendentals=0,
                           bytes_accessed=bytes_accessed)

    out_pad, recon_pad = pl.pallas_call(
        sccrt_kernel,
        out_shape=out_shapes,
        grid_spec=pltpu.PrefetchScalarGridSpec(
            num_scalar_prefetch=0,
            grid=(num_tiles,),
            in_specs=[
                pl.BlockSpec((tb, input_size), lambda i: (i, 0)),              # x tile (f32)
                resident((input_size, middle_size)),  resident((1, middle_size)),   # w1, b1
                resident((middle_size, hidden_size)), resident((1, hidden_size)),   # w2, b2
                resident((hidden_size, middle_size)), resident((1, middle_size)),   # w3, b3
                resident((middle_size, input_size)),  resident((1, input_size)),    # w4, b4
            ],
            out_specs=[
                pl.BlockSpec((tb, hidden_size), lambda i: (i, 0)),
                pl.BlockSpec((tb, input_size), lambda i: (i, 0)),
            ],
        ),
        compiler_params=pltpu.CompilerParams(
            dimension_semantics=("parallel",),
            vmem_limit_bytes=vmem_limit),
        cost_estimate=cost,
    )(xp, w1, b1, w2, b2, w3, b3, w4, b4)

    if B_pad != B:
        out_pad = out_pad[:B]
        recon_pad = recon_pad[:B]
    return out_pad, recon_pad


def init_params(key, input_size, middle_size, hidden_size):
    """Deterministic init (uniform, torch Linear's kaiming-uniform range), f32."""
    def linear(key, fan_in, fan_out):
        k1, k2 = jax.random.split(key)
        bound = 1.0 / np.sqrt(fan_in)
        w = jax.random.uniform(k1, (fan_in, fan_out), jnp.float32, -bound, bound)
        b = jax.random.uniform(k2, (1, fan_out), jnp.float32, -bound, bound)
        return w, b

    k1, k2, k3, k4 = jax.random.split(key, 4)
    return (
        linear(k1, input_size, middle_size),   # encoder layer 1
        linear(k2, middle_size, hidden_size),  # encoder layer 2
        linear(k3, hidden_size, middle_size),  # decoder layer 1
        linear(k4, middle_size, input_size),   # decoder layer 2
    )


def sccrt_reference(x, params_f32, compute_dtype=jnp.float32):
    """Pure-JAX reference mirroring the kernel's dtype handling (f32 accumulation)."""
    (w1, b1), (w2, b2), (w3, b3), (w4, b4) = params_f32
    c = jnp.dtype(compute_dtype)
    xc = x.astype(c)
    h1 = jnp.maximum(
        jnp.dot(xc, w1.astype(c), preferred_element_type=jnp.float32) + b1, 0.0)
    z = jnp.dot(h1.astype(c), w2.astype(c),
                preferred_element_type=jnp.float32) + b2
    h2 = jnp.maximum(
        jnp.dot(z.astype(c), w3.astype(c), preferred_element_type=jnp.float32) + b3, 0.0)
    recon = jnp.dot(h2.astype(c), w4.astype(c),
                    preferred_element_type=jnp.float32) + b4
    return z, recon


if __name__ == "__main__":
    key = jax.random.PRNGKey(0)
    kx, kp = jax.random.split(key)

    batch, input_size, middle_size, hidden_size = 64, 256, 128, 128

    x = jax.random.normal(kx, (batch, input_size), jnp.float32)
    params_f32 = init_params(kp, input_size, middle_size, hidden_size)

    # Exact-precision path (f32 MXU inputs, f32 outputs) -- tight check.
    params_exact = prepare_params(params_f32, jnp.float32)
    out_f32, rec_f32 = sccrt_forward(x, params_exact)
    jax.block_until_ready((out_f32, rec_f32))
    ref_out, ref_rec = sccrt_reference(x, params_f32, jnp.float32)
    np.testing.assert_allclose(np.asarray(out_f32), np.asarray(ref_out),
                               rtol=1e-5, atol=1e-5)
    np.testing.assert_allclose(np.asarray(rec_f32), np.asarray(ref_rec),
                               rtol=1e-5, atol=1e-5)

    # Fast path: bf16 MXU inputs, f32 accumulation, bf16 out/recon stores.
    # NOTE: this changes numerics vs a pure-f32 PyTorch scCRT (documented).
    params_bf16 = prepare_params(params_f32, jnp.bfloat16)
    out_bf, rec_bf = sccrt_forward(x, params_bf16)
    jax.block_until_ready((out_bf, rec_bf))
    ref_out_bf, ref_rec_bf = sccrt_reference(x, params_f32, jnp.bfloat16)
    np.testing.assert_allclose(np.asarray(out_bf.astype(jnp.float32)),
                               np.asarray(ref_out_bf), rtol=2e-2, atol=2e-2)
    np.testing.assert_allclose(np.asarray(rec_bf.astype(jnp.float32)),
                               np.asarray(ref_rec_bf), rtol=2e-2, atol=2e-2)

    print("KERNEL_OK")
</pallas_src>

<mosaic_0001>
module attributes {stable_mosaic.version = 11 : i64} {
  func.func @sccrt_kernel(%arg0: i32, %arg1: memref<32x256xf32, #tpu.memory_space<vmem>>, %arg2: memref<256x128xf32, #tpu.memory_space<vmem>>, %arg3: memref<1x128xf32, #tpu.memory_space<vmem>>, %arg4: memref<128x128xf32, #tpu.memory_space<vmem>>, %arg5: memref<1x128xf32, #tpu.memory_space<vmem>>, %arg6: memref<128x128xf32, #tpu.memory_space<vmem>>, %arg7: memref<1x128xf32, #tpu.memory_space<vmem>>, %arg8: memref<128x256xf32, #tpu.memory_space<vmem>>, %arg9: memref<1x256xf32, #tpu.memory_space<vmem>>, %arg10: memref<32x128xf32, #tpu.memory_space<vmem>>, %arg11: memref<32x256xf32, #tpu.memory_space<vmem>>) attributes {dimension_semantics = [#tpu.dimension_semantics<parallel>], iteration_bounds = array<i64: 2>, scalar_prefetch = 0 : i64, scratch_operands = 0 : i64, tpu.core_type = #tpu.core_type<tc>, window_params = [{transform_indices = @transform_0, window_bounds = array<i64: 32, 256>}, {pipeline_mode = #tpu.pipeline_mode<synchronous>, transform_indices = @transform_1, window_bounds = array<i64: 256, 128>}, {pipeline_mode = #tpu.pipeline_mode<synchronous>, transform_indices = @transform_2, window_bounds = array<i64: 1, 128>}, {pipeline_mode = #tpu.pipeline_mode<synchronous>, transform_indices = @transform_3, window_bounds = array<i64: 128, 128>}, {pipeline_mode = #tpu.pipeline_mode<synchronous>, transform_indices = @transform_4, window_bounds = array<i64: 1, 128>}, {pipeline_mode = #tpu.pipeline_mode<synchronous>, transform_indices = @transform_5, window_bounds = array<i64: 128, 128>}, {pipeline_mode = #tpu.pipeline_mode<synchronous>, transform_indices = @transform_6, window_bounds = array<i64: 1, 128>}, {pipeline_mode = #tpu.pipeline_mode<synchronous>, transform_indices = @transform_7, window_bounds = array<i64: 128, 256>}, {pipeline_mode = #tpu.pipeline_mode<synchronous>, transform_indices = @transform_8, window_bounds = array<i64: 1, 256>}, {transform_indices = @transform_9, window_bounds = array<i64: 32, 128>}, {transform_indices = @transform_10, window_bounds = array<i64: 32, 256>}]} {
    %c0 = arith.constant 0 : index
    %c0_0 = arith.constant 0 : index
    %0 = vector.load %arg1[%c0, %c0_0] : memref<32x256xf32, #tpu.memory_space<vmem>>, vector<32x256xf32>
    %c0_1 = arith.constant 0 : index
    %c0_2 = arith.constant 0 : index
    %1 = vector.load %arg2[%c0_1, %c0_2] : memref<256x128xf32, #tpu.memory_space<vmem>>, vector<256x128xf32>
    %cst = arith.constant dense<0.000000e+00> : vector<32x128xf32>
    %2 = tpu.matmul %0, %1, %cst {dimension_numbers = #tpu.dot_dimension_numbers<[1], [0], [0], [1], [0, 0, 1, 1], [], []>} : vector<32x256xf32>, vector<256x128xf32>, vector<32x128xf32> -> vector<32x128xf32>
    %c0_3 = arith.constant 0 : index
    %c0_4 = arith.constant 0 : index
    %3 = vector.load %arg3[%c0_3, %c0_4] : memref<1x128xf32, #tpu.memory_space<vmem>>, vector<1x128xf32>
    %4 = vector.broadcast %3 : vector<1x128xf32> to vector<32x128xf32>
    %5 = arith.addf %2, %4 : vector<32x128xf32>
    %cst_5 = arith.constant 0.000000e+00 : f32
    %6 = vector.broadcast %cst_5 : f32 to vector<32x128xf32>
    %7 = arith.maximumf %5, %6 : vector<32x128xf32>
    %c0_6 = arith.constant 0 : index
    %c0_7 = arith.constant 0 : index
    %8 = vector.load %arg4[%c0_6, %c0_7] : memref<128x128xf32, #tpu.memory_space<vmem>>, vector<128x128xf32>
    %cst_8 = arith.constant dense<0.000000e+00> : vector<32x128xf32>
    %9 = tpu.matmul %7, %8, %cst_8 {dimension_numbers = #tpu.dot_dimension_numbers<[1], [0], [0], [1], [0, 0, 1, 1], [], []>} : vector<32x128xf32>, vector<128x128xf32>, vector<32x128xf32> -> vector<32x128xf32>
    %c0_9 = arith.constant 0 : index
    %c0_10 = arith.constant 0 : index
    %10 = vector.load %arg5[%c0_9, %c0_10] : memref<1x128xf32, #tpu.memory_space<vmem>>, vector<1x128xf32>
    %11 = vector.broadcast %10 : vector<1x128xf32> to vector<32x128xf32>
    %12 = arith.addf %9, %11 : vector<32x128xf32>
    %c0_11 = arith.constant 0 : index
    %c0_12 = arith.constant 0 : index
    %13 = vector.load %arg10[%c0_11, %c0_12] : memref<32x128xf32, #tpu.memory_space<vmem>>, vector<32x128xf32>
    tpu.vector_store %arg10[%c0_11, %c0_12], %12 {strides = array<i32>} : memref<32x128xf32, #tpu.memory_space<vmem>>, vector<32x128xf32>,
    %c0_13 = arith.constant 0 : index
    %c0_14 = arith.constant 0 : index
    %14 = vector.load %arg6[%c0_13, %c0_14] : memref<128x128xf32, #tpu.memory_space<vmem>>, vector<128x128xf32>
    %cst_15 = arith.constant dense<0.000000e+00> : vector<32x128xf32>
    %15 = tpu.matmul %12, %14, %cst_15 {dimension_numbers = #tpu.dot_dimension_numbers<[1], [0], [0], [1], [0, 0, 1, 1], [], []>} : vector<32x128xf32>, vector<128x128xf32>, vector<32x128xf32> -> vector<32x128xf32>
    %c0_16 = arith.constant 0 : index
    %c0_17 = arith.constant 0 : index
    %16 = vector.load %arg7[%c0_16, %c0_17] : memref<1x128xf32, #tpu.memory_space<vmem>>, vector<1x128xf32>
    %17 = vector.broadcast %16 : vector<1x128xf32> to vector<32x128xf32>
    %18 = arith.addf %15, %17 : vector<32x128xf32>
    %cst_18 = arith.constant 0.000000e+00 : f32
    %19 = vector.broadcast %cst_18 : f32 to vector<32x128xf32>
    %20 = arith.maximumf %18, %19 : vector<32x128xf32>
    %c0_19 = arith.constant 0 : index
    %c0_20 = arith.constant 0 : index
    %21 = vector.load %arg8[%c0_19, %c0_20] : memref<128x256xf32, #tpu.memory_space<vmem>>, vector<128x256xf32>
    %cst_21 = arith.constant dense<0.000000e+00> : vector<32x256xf32>
    %22 = tpu.matmul %20, %21, %cst_21 {dimension_numbers = #tpu.dot_dimension_numbers<[1], [0], [0], [1], [0, 0, 1, 1], [], []>} : vector<32x128xf32>, vector<128x256xf32>, vector<32x256xf32> -> vector<32x256xf32>
    %c0_22 = arith.constant 0 : index
    %c0_23 = arith.constant 0 : index
    %23 = vector.load %arg9[%c0_22, %c0_23] : memref<1x256xf32, #tpu.memory_space<vmem>>, vector<1x256xf32>
    %24 = vector.broadcast %23 : vector<1x256xf32> to vector<32x256xf32>
    %25 = arith.addf %22, %24 : vector<32x256xf32>
    %c0_24 = arith.constant 0 : index
    %c0_25 = arith.constant 0 : index
    %26 = vector.load %arg11[%c0_24, %c0_25] : memref<32x256xf32, #tpu.memory_space<vmem>>, vector<32x256xf32>
    tpu.vector_store %arg11[%c0_24, %c0_25], %25 {strides = array<i32>} : memref<32x256xf32, #tpu.memory_space<vmem>>, vector<32x256xf32>,
    return
  }
  func.func @transform_0(%arg0: i32) -> (i32, i32) {
    %c0_i32 = arith.constant 0 : i32
    %c0_i32_0 = arith.constant 0 : i32
    return %arg0, %c0_i32 : i32, i32
  }
  func.func @transform_1(%arg0: i32) -> (i32, i32) {
    %c0_i32 = arith.constant 0 : i32
    %c0_i32_0 = arith.constant 0 : i32
    %c0_i32_1 = arith.constant 0 : i32
    return %c0_i32, %c0_i32_0 : i32, i32
  }
  func.func @transform_2(%arg0: i32) -> (i32, i32) {
    %c0_i32 = arith.constant 0 : i32
    %c0_i32_0 = arith.constant 0 : i32
    %c0_i32_1 = arith.constant 0 : i32
    return %c0_i32, %c0_i32_0 : i32, i32
  }
  func.func @transform_3(%arg0: i32) -> (i32, i32) {
    %c0_i32 = arith.constant 0 : i32
    %c0_i32_0 = arith.constant 0 : i32
    %c0_i32_1 = arith.constant 0 : i32
    return %c0_i32, %c0_i32_0 : i32, i32
  }
  func.func @transform_4(%arg0: i32) -> (i32, i32) {
    %c0_i32 = arith.constant 0 : i32
    %c0_i32_0 = arith.constant 0 : i32
    %c0_i32_1 = arith.constant 0 : i32
    return %c0_i32, %c0_i32_0 : i32, i32
  }
  func.func @transform_5(%arg0: i32) -> (i32, i32) {
    %c0_i32 = arith.constant 0 : i32
    %c0_i32_0 = arith.constant 0 : i32
    %c0_i32_1 = arith.constant 0 : i32
    return %c0_i32, %c0_i32_0 : i32, i32
  }
  func.func @transform_6(%arg0: i32) -> (i32, i32) {
    %c0_i32 = arith.constant 0 : i32
    %c0_i32_0 = arith.constant 0 : i32
    %c0_i32_1 = arith.constant 0 : i32
    return %c0_i32, %c0_i32_0 : i32, i32
  }
  func.func @transform_7(%arg0: i32) -> (i32, i32) {
    %c0_i32 = arith.constant 0 : i32
    %c0_i32_0 = arith.constant 0 : i32
    %c0_i32_1 = arith.constant 0 : i32
    return %c0_i32, %c0_i32_0 : i32, i32
  }
  func.func @transform_8(%arg0: i32) -> (i32, i32) {
    %c0_i32 = arith.constant 0 : i32
    %c0_i32_0 = arith.constant 0 : i32
    %c0_i32_1 = arith.constant 0 : i32
    return %c0_i32, %c0_i32_0 : i32, i32
  }
  func.func @transform_9(%arg0: i32) -> (i32, i32) {
    %c0_i32 = arith.constant 0 : i32
    %c0_i32_0 = arith.constant 0 : i32
    return %arg0, %c0_i32 : i32, i32
  }
  func.func @transform_10(%arg0: i32) -> (i32, i32) {
    %c0_i32 = arith.constant 0 : i32
    %c0_i32_0 = arith.constant 0 : i32
    return %arg0, %c0_i32 : i32, i32
  }
}

</mosaic_0001>

<bundles_post_ra>
// kernel: tpu_custom_call.1
= control target key start
LH: loop header
LB: loop body
LE: loop exit
PB: predicated region body
PF: predicated region fallthrough
CT: control target
= control target key end

     0   :  { %s2235_s0 = inlined_call_operand.hbm [shape: f32[64,256], index: 0, kind: input, shape index: {}]   ;;  %s2236_s1 = inlined_call_operand.hbm [shape: f32[256,128], index: 1, kind: input, shape index: {}]   ;;  %s2237_s2 = inlined_call_operand.vmem [shape: f32[1,128], index: 2, kind: input, shape index: {}]   ;;  %s2238_s3 = inlined_call_operand.hbm [shape: f32[128,128], index: 3, kind: input, shape index: {}]   ;;  %s2239_s4 = inlined_call_operand.vmem [shape: f32[1,128], index: 4, kind: input, shape index: {}]   ;;  %s2240_s5 = inlined_call_operand.hbm [shape: f32[128,128], index: 5, kind: input, shape index: {}]   ;;  %s2241_s6 = inlined_call_operand.vmem [shape: f32[1,128], index: 6, kind: input, shape index: {}]   ;;  %s2242_s7 = inlined_call_operand.hbm [shape: f32[128,256], index: 7, kind: input, shape index: {}]   ;;  %s2243_s8 = inlined_call_operand.vmem [shape: f32[1,256], index: 8, kind: input, shape index: {}]   ;;  %s2244_s9 = inlined_call_operand.hbm [shape: f32[64,128], index: 9, kind: output, shape index: {0}]   ;;  %s2245_s10 = inlined_call_operand.hbm [shape: f32[64,256], index: 10, kind: output, shape index: {1}]  }
   0x1   :  { %2252 = sst [smem:[#allocation21_spill]] %s2243_s8 }
   0x2   :  { %2253 = sst [smem:[#allocation22_spill]] %s2245_s10 }
   0x3   :  { %16 = vsyncpa [#allocation3], 0 }
   0x4   :  { %18 = vsyncpa [#allocation3 + $0x1], 0 }
   0x5   :  { %19 = vsyncpa [#allocation6], 0 }
   0x6   :  { %20 = vsyncpa [#allocation9], 0 }
   0x7   :  { %21 = vsyncpa [#allocation4], 0 }
   0x8   :  { %23 = vsyncpa [#allocation4 + $0x1], 0 }
   0x9   :  { %24 = vsyncpa [#allocation13], 0 }
   0xa   :  { %26 = vsyncpa [#allocation13 + $0x1], 0  ;;  %s1877_s13 = smov 0   ;;  %s1879_s14 = smov 0  }
   0xb   :  { %s1881_s15 = smov 0   ;;  %s1883_s16 = smov 0  }
   0xc LB: > { %2254 = sst [smem:[#allocation19_spill]] %s1792_s13  ;;  %s1898_s17 = sadd.s32 4294967295, %s1804_s16   ;;  %s1804_s16 = sphi %s1883_s16, %s2279_s16   ;;  %s1800_s15 = sphi %s1881_s15, %s2278_s15   ;;  %s1796_s14 = sphi %s1879_s14, %s2277_s14   ;;  %s1792_s13 = sphi %s1877_s13, %s2276_s13  }
   0xd   : > { %s1131_s18 = sadd.s32 4294967294, %s1804_s16   ;;  %p52_p0 = scmp.ne.s32.totalorder %s1796_s14, %s1792_s13 }
   0xe   : > { %p2246_p1 = scmp.eq.s32.totalorder %s1898_s17, 0  ;;  %p250_p3 = scmp.eq.s32.totalorder %s1131_s18, 1 }
   0xf   : > { %p1132_p5 = scmp.ge.s32.totalorder %s1804_s16, 1  ;;  %p283_p7 = scmp.lt.s32.totalorder %s1804_s16, 3 }
  0x10   : > { %p1907_p4 = por %p2246_p1, %p52_p0  ;;  %p1912_p6 = por %p250_p3, %p52_p0 }
  0x11   : > { %p1917_p8 = pnand %p1132_p5, %p283_p7  ;;  %s1806_s22 = smov [#allocation5]  }
  0x12   : > { %s2255_s19 = scalar_select %p1907_p4, 1, 0 }
  0x13   : > { %s2256_s20 = scalar_select %p1912_p6, 1, 0 }
  0x14   : > { %s2258_s21 = scalar_select %p1917_p8, 1, 0 }
  0x15   : > { %2257 = sst [smem:[#allocation20_spill]] %s2256_s20  ;;  %s295_s23 = sshll.u32 %s1806_s22, 4  ;;  %s1921_s23 = int_to_ptr.vmem [resolvable:$true] %s295_s23 }
  0x16   : > { %p1477_p9 = pneg %p1917_p8  ;;  %s1807_s25 = smov [#allocation8]  }
  0x17   : > { %s327_s26 = sshll.u32 %s1807_s25, 4  ;;  %s1808_s27 = smov [#allocation7]   ;;  %s1932_s26 = int_to_ptr.vmem [resolvable:$true] %s327_s26 }
  0x18   : > { %p1928_p11 = pnand %p1477_p9, %p2246_p1  ;;  %s1934_s28 = sshll.u32 %s1808_s27, 4  ;;  %s312_s28 = int_to_ptr.vmem [resolvable:$true] %s1934_s28 }
  0x19   : > { %s1556_s11 = scalar_lea.hbm %s2236_s1, 4096 }
  0x1a   : > { %p1557_p12 = scmp.ne.s32.totalorder %s2236_s1, %s1556_s11  ;;  %p1944_p13 = pneg %p1928_p11 }
  0x1b   : > { %p1563_p5 = scmp.lt.u32.totalorder %s1556_s11, %s2236_s1 }
  0x1c   : > { %p1559_p0 = pnand %p1944_p13, %p1557_p12 }
  0x1e   : > { %p1560_p3 = pneg %p1559_p0 }
  0x20   : > { %p1565_p7 = pnand %p1563_p5, %p1560_p3 }
  0x22   : > { %1568 = shalt.err (!%p1565_p7)
}
  0x23   : > { %s1569_s29 = scalar_lea.vmem %s1921_s23, 4096  ;;  %p1577_p2 = scmp.lt.s32.totalorder %s1921_s23, %s1921_s23 }
  0x24   : > { %p1570_p9 = scmp.ne.s32.totalorder %s1921_s23, %s1569_s29  ;;  %p1578_p6 = scmp.lt.s32.totalorder %s1569_s29, %s1569_s29 }
  0x26   : > { %p1572_p10 = pnand %p1570_p9, %p1944_p13  ;;  %p1579_p12 = por %p1578_p6, %p1577_p2 }
  0x28   : > { %p1573_p1 = pneg %p1572_p10 }
  0x2a   : > { %p1580_p0 = pnand %p1579_p12, %p1573_p1 }
  0x2c   : > { %1583 = shalt.err (!%p1580_p0)
}
  0x2d   : > { %s1809_s30 = smov 128   ;;  %s1810_s11 = smov 8  }
  0x2e   : > { %1480 = dma.hbm_to_vmem [thread:$0]  (!%p1928_p11), %s2236_s1, 4096, %s1921_s23, [#allocation6], %s1809_s30, %s1809_s30, %s1810_s11  }
  0x2f   : > { %s1584_s29 = scalar_lea.hbm %s2240_s5, 2048 }
  0x30   : > { %p1585_p1 = scmp.ne.s32.totalorder %s2240_s5, %s1584_s29  ;;  %p1591_p10 = scmp.lt.u32.totalorder %s1584_s29, %s2240_s5 }
  0x32   : > { %p1587_p2 = pnand %p1585_p1, %p1944_p13 }
  0x34   : > { %p1588_p6 = pneg %p1587_p2 }
  0x36   : > { %p1593_p3 = pnand %p1591_p10, %p1588_p6 }
  0x38   : > { %1596 = shalt.err (!%p1593_p3)
}
  0x39   : > { %s1597_s23 = scalar_lea.vmem %s1932_s26, 2048  ;;  %p1605_p12 = scmp.lt.s32.totalorder %s1932_s26, %s1932_s26 }
  0x3a   : > { %p1598_p5 = scmp.ne.s32.totalorder %s1932_s26, %s1597_s23  ;;  %p1606_p0 = scmp.lt.s32.totalorder %s1597_s23, %s1597_s23 }
  0x3c   : > { %p1600_p7 = pnand %p1598_p5, %p1944_p13  ;;  %p1607_p1 = por %p1606_p0, %p1605_p12 }
  0x3e   : > { %p1601_p9 = pneg %p1600_p7 }
  0x40   : > { %p1608_p2 = pnand %p1607_p1, %p1601_p9 }
  0x42   : > { %1611 = shalt.err (!%p1608_p2)
}
  0x43   : > { %1486 = dma.hbm_to_vmem [thread:$0]  (!%p1928_p11), %s2240_s5, 2048, %s1932_s26, [#allocation9], %s1809_s30, %s1809_s30, %s1810_s11  }
  0x44   : > { %s1612_s12 = scalar_lea.hbm %s2238_s3, 2048 }
  0x45   : > { %p1613_p6 = scmp.ne.s32.totalorder %s2238_s3, %s1612_s12  ;;  %p1619_p5 = scmp.lt.u32.totalorder %s1612_s12, %s2238_s3 }
  0x47   : > { %p1615_p10 = pnand %p1613_p6, %p1944_p13 }
  0x49   : > { %p1616_p3 = pneg %p1615_p10 }
  0x4b   : > { %p1621_p7 = pnand %p1619_p5, %p1616_p3 }
  0x4d   : > { %1624 = shalt.err (!%p1621_p7)
}
  0x4e   : > { %s1625_s23 = scalar_lea.vmem %s312_s28, 2048  ;;  %p1633_p1 = scmp.lt.s32.totalorder %s312_s28, %s312_s28 }
  0x4f   : > { %p1626_p9 = scmp.ne.s32.totalorder %s312_s28, %s1625_s23  ;;  %p1634_p2 = scmp.lt.s32.totalorder %s1625_s23, %s1625_s23 }
  0x51   : > { %p1628_p12 = pnand %p1626_p9, %p1944_p13  ;;  %p1635_p4 = por %p1634_p2, %p1633_p1 }
  0x53   : > { %p1629_p0 = pneg %p1628_p12 }
  0x55   : > { %p1636_p8 = pnand %p1635_p4, %p1629_p0 }
  0x57   : > { %1639 = shalt.err (!%p1636_p8)
}
  0x58   : > { %1483 = dma.hbm_to_vmem [thread:$0]  (!%p1928_p11), %s2238_s3, 2048, %s312_s28, [#allocation6], %s1809_s30, %s1809_s30, %s1810_s11  }
  0x59   : > { %s1811_s10 = smov [#allocation10]   ;;  %s1640_s18 = scalar_lea.hbm %s2242_s7, 4096 }
  0x5a   : > { %s343_s13 = sshll.u32 %s1811_s10, 4  ;;  %p1641_p4 = scmp.ne.s32.totalorder %s2242_s7, %s1640_s18  ;;  %s344_s13 = int_to_ptr.vmem [resolvable:$true] %s343_s13 }
  0x5b   : > { %p1647_p10 = scmp.lt.u32.totalorder %s1640_s18, %s2242_s7 }
  0x5c   : > { %p1643_p8 = pnand %p1641_p4, %p1944_p13 }
  0x5e   : > { %p1644_p6 = pneg %p1643_p8 }
  0x60   : > { %p1649_p3 = pnand %p1647_p10, %p1644_p6 }
  0x62   : > { %1652 = shalt.err (!%p1649_p3)
}
  0x63   : > { %s1653_s28 = scalar_lea.vmem %s344_s13, 4096  ;;  %p1661_p12 = scmp.lt.s32.totalorder %s344_s13, %s344_s13 }
  0x64   : > { %p1654_p5 = scmp.ne.s32.totalorder %s344_s13, %s1653_s28  ;;  %p1662_p0 = scmp.lt.s32.totalorder %s1653_s28, %s1653_s28 }
  0x66   : > { %p1656_p7 = pnand %p1654_p5, %p1944_p13  ;;  %p1663_p1 = por %p1662_p0, %p1661_p12 }
  0x68   : > { %p1657_p9 = pneg %p1656_p7 }
  0x6a   : > { %p1664_p2 = pnand %p1663_p1, %p1657_p9 }
  0x6c   : > { %1667 = shalt.err (!%p1664_p2)
}
  0x6d   : > { %s1812_s30 = smov 256   ;;  %s1813_s22 = smov 16  }
  0x6e   : > { %1489 = dma.hbm_to_vmem [thread:$0]  (!%p1928_p11), %s2242_s7, 4096, %s344_s13, [#allocation9], %s1812_s30, %s1812_s30, %s1813_s22  }
  0x6f   : > { %s2038_s8 = sadd.s32 1, %s1804_s16   ;;  %s39_s20 = sadd.s32 1, %s1800_s15 }
  0x70   : > { %s36_s10 = ssub.s32 %s1804_s16, %s2038_s8  ;;  %p46_p4 = scmp.ne.s32.totalorder %s1800_s15, %s1796_s14 }
  0x71   : > { %p37_p13 = scmp.eq.s32.totalorder %s36_s10, 0  ;;  %p47_p8 = scmp.eq.s32.totalorder %s1804_s16, 0 }
  0x72   : > { %p2261_p10 = scmp.eq.s32.totalorder %s1898_s17, 1  ;;  %p1505_p5 = scmp.lt.s32.totalorder %s1804_s16, 2 }
  0x73   : > { %s2047_s12 = scalar_select %p37_p13, %s1800_s15, %s39_s20  }
  0x74   : > { %p48_p6 = por %p47_p8, %p46_p4  ;;  %p2051_p3 = por %p2261_p10, %p46_p4 }
  0x75   : > { %s360_s18 = sand.u32 1, %s1800_s15   ;;  %s1163_s13 = sshll.u32 %s1804_s16, 10 }
  0x76   : > { %s1138_s25 = sshll.u32 %s360_s18, 6  ;;  %s2061_s23 = scalar_lea.hbm %s2235_s0, %s1163_s13 }
  0x77   : > { %s364_s28 = scalar_lea.vmem [#allocation2], %s1138_s25  ;;  %p2065_p11 = pnand %p1505_p5, %p48_p6 }
  0x78   : > { %s372_s11 = sshll.u32 %s364_s28, 4  ;;  %s2069_s10 = scalar_lea.sflag [#allocation3], %s360_s18  ;;  %s2063_s11 = int_to_ptr.vmem [resolvable:$true] %s372_s11 }
  0x79   : > { %s1668_s20 = scalar_lea.hbm %s2061_s23, 1024  ;;  %p1670_p9 = pneg %p2065_p11 }
  0x7a   : > { %p1669_p7 = scmp.ne.s32.totalorder %s2061_s23, %s1668_s20  ;;  %s1673_s27 = scalar_lea.hbm %s2235_s0, 2048 }
  0x7b   : > { %p1674_p1 = scmp.lt.u32.totalorder %s2061_s23, %s2235_s0  ;;  %p1675_p2 = scmp.lt.u32.totalorder %s1673_s27, %s1668_s20 }
  0x7c   : > { %p1671_p12 = pnand %p1670_p9, %p1669_p7  ;;  %p1677_p4 = scmp.lt.u32.totalorder %s1668_s20, %s2061_s23 }
  0x7d   : > { %p1676_p13 = por %p1675_p2, %p1674_p1 }
  0x7e   : > { %p1672_p0 = pneg %p1671_p12 }
  0x7f   : > { %p1678_p8 = por %p1677_p4, %p1676_p13 }
  0x81   : > { %p1679_p6 = pnand %p1678_p8, %p1672_p0 }
  0x83   : > { %1682 = shalt.err (!%p1679_p6)
}
  0x84   : > { %s1683_s18 = scalar_lea.vmem %s2063_s11, 1024  ;;  %s1814_s25 = smov [#allocation2]  }
  0x85   : > { %p1684_p10 = scmp.ne.s32.totalorder %s2063_s11, %s1683_s18  ;;  %s1688_s13 = sshll.u32 %s1814_s25, 4  ;;  %s1689_s13 = int_to_ptr.vmem [resolvable:$false] %s1688_s13 }
  0x86   : > { %s1690_s29 = scalar_lea.vmem %s1689_s13, 2048  ;;  %p1691_p12 = scmp.lt.s32.totalorder %s2063_s11, %s1689_s13 }
  0x87   : > { %p1686_p5 = pnand %p1684_p10, %p1670_p9  ;;  %p1692_p1 = scmp.lt.s32.totalorder %s1690_s29, %s1683_s18 }
  0x89   : > { %p1687_p7 = pneg %p1686_p5  ;;  %p1693_p2 = por %p1692_p1, %p1691_p12 }
  0x8b   : > { %p1694_p13 = pnand %p1693_p2, %p1687_p7 }
  0x8d   : > { %1697 = shalt.err (!%p1694_p13)
}
  0x8e   : > { %1493 = dma.hbm_to_vmem [thread:$0]  (!%p2065_p11), %s2061_s23, 1024, %s2063_s11, %s2069_s10, %s1812_s30, %s1812_s30, %s1813_s22  }
  0x8f   : > { %p2264_p9 = scmp.ne.s32.totalorder %s2258_s21, 0 }
  0x90   : > { %s2103_s20 = sand.u32 (!%p2264_p9), 1, %s1796_s14   ;;  %p2265_p0 = scmp.ne.s32.totalorder (!%p2264_p9), %s2255_s19, 0 }
  0x91   : > { %384 = sbr.rel (%p2264_p9) target bundleno = 1093 (0x445), region = 56  ;;  %s1143_s27 = sshll.u32 (!%p2264_p9), %s2103_s20, 6 }
  0x92   : > { %s387_s28 = scalar_lea.sflag (!%p2264_p9), [#allocation3], %s2103_s20  ;;  %s2109_s26 = scalar_lea.vmem (!%p2264_p9), [#allocation2], %s1143_s27 }
  0x98   : > { %1771 = dma.done.wait (%p2265_p0), %s387_s28, 1024  }
  0x99   : > { %1773 = vsyncadd (%p2265_p0), %s387_s28, 4294966272  ;;  %p2266_p11 = scmp.eq.s32.totalorder %s1898_s17, 0 }
  0x9b   : > { %1775 = dma.done.wait (%p2266_p11), [#allocation6], 6144   ;;  %p2267_p4 = pmov %p2266_p11 }
  0x9d   : > { %1777 = vsyncadd (%p2267_p4), [#allocation6], 4294961152  ;;  %p2268_p8 = pmov %p2267_p4 }
  0x9e   : > { %p2269_p6 = pmov %p2267_p4 }
  0x9f   : > { %1779 = dma.done.wait (%p2268_p8), [#allocation9], 6144  }
  0xa0   : > { %1781 = vsyncadd (%p2269_p6), [#allocation9], 4294961152  ;;  %v475_v0 = vld [vmem:[#allocation5 + $0x80] sm:$0xff]  ;;  %v476_v1 = vld [vmem:[#allocation5 + $0x88] sm:$0xff]  ;;  %s1148_s30 = sshll.u32 %s2103_s20, 5  ;;  %s1164_s13 = sshll.u32 %s1898_s17, 9 }
  0xa1   : > { %v459_v2 = vld [vmem:[#allocation5] sm:$0xff]  ;;  %v1327_v3 = vpack.c.bf16 %v476_v1, %v475_v0  ;;  %v460_v4 = vld [vmem:[#allocation5 + $0x8] sm:$0xff]  ;;  %v477_v5 = vld [vmem:[#allocation5 + $0x90] sm:$0xff]  ;;  %s2138_s11 = scalar_lea.vmem [#allocation11], %s1148_s30  ;;  %s953_s19 = scalar_lea.sflag [#allocation4], %s2103_s20 }
  0xa2   : > { %v478_v6 = vld [vmem:[#allocation5 + $0x98] sm:$0xff]  ;;  %v1329_v7 = vpack.c.bf16 %v460_v4, %v459_v2  ;;  %v461_v9 = vld [vmem:[#allocation5 + $0x10] sm:$0xff]  ;;  %v479_v11 = vld [vmem:[#allocation5 + $0xa0] sm:$0xff]  ;;  %s971_s25 = sshll.u32 %s2138_s11, 4  ;;  %s1816_s30 = smov [#allocation11]   ;;  %s2148_s25 = int_to_ptr.vmem [resolvable:$true] %s971_s25 }
  0xa3   : > { %v1331_v8 = vpack.c.bf16 %v478_v6, %v477_v5  ;;  %v462_v10 = vld [vmem:[#allocation5 + $0x18] sm:$0xff]  ;;  %1328 = vmatprep.subr.bf16.mxu0 %v1327_v3  ;;  %v480_v12 = vld [vmem:[#allocation5 + $0xa8] sm:$0xff]  ;;  %v463_v15 = vld [vmem:[#allocation5 + $0x20] sm:$0xff]  ;;  %s1698_s21 = scalar_lea.vmem %s2148_s25, 512  ;;  %s1702_s22 = sshll.u32 %s1816_s30, 4  ;;  %s1703_s22 = int_to_ptr.vmem [resolvable:$false] %s1702_s22 }
  0xa4   : > { %1330 = vmatpush3.bf16.msra.mxu0 %v1329_v7  ;;  %v1333_v13 = vpack.c.bf16 %v462_v10, %v461_v9  ;;  %v1335_v14 = vpack.c.bf16 %v480_v12, %v479_v11  ;;  %v464_v16 = vld [vmem:[#allocation5 + $0x28] sm:$0xff]  ;;  %v481_v17 = vld [vmem:[#allocation5 + $0xb0] sm:$0xff]  ;;  %v482_v18 = vld [vmem:[#allocation5 + $0xb8] sm:$0xff]  ;;  %p1699_p10 = scmp.ne.s32.totalorder %s2148_s25, %s1698_s21  ;;  %s1704_s23 = scalar_lea.vmem %s1703_s22, 1024 }
  0xa5   : > { %1332 = vmatprep.subr.bf16.mxu0 %v1331_v8  ;;  %v1337_v19 = vpack.c.bf16 %v464_v16, %v463_v15  ;;  %v1339_v20 = vpack.c.bf16 %v482_v18, %v481_v17  ;;  %v465_v21 = vld [vmem:[#allocation5 + $0x30] sm:$0xff]  ;;  %v466_v22 = vld [vmem:[#allocation5 + $0x38] sm:$0xff]  ;;  %v483_v23 = vld [vmem:[#allocation5 + $0xc0] sm:$0xff]  ;;  %p1705_p12 = scmp.lt.s32.totalorder %s2148_s25, %s1703_s22  ;;  %p1706_p1 = scmp.lt.s32.totalorder %s1704_s23, %s1698_s21 }
  0xa6   : > { %v484_v24 = vld [vmem:[#allocation5 + $0xc8] sm:$0xff]  ;;  %v1341_v26 = vpack.c.bf16 %v466_v22, %v465_v21  ;;  %v467_v27 = vld [vmem:[#allocation5 + $0x40] sm:$0xff]  ;;  %v485_v30 = vld [vmem:[#allocation5 + $0xd0] sm:$0xff]  ;;  %p1700_p5 = pnand %p1699_p10, %p2051_p3 }
  0xa7   : > { %v452_v25 = vld [vmem:[%s2109_s26 + $0x8] sm:$0xff]  ;;  %v1343_v29 = vpack.c.bf16 %v484_v24, %v483_v23  ;;  %v587_v31 = vld [vmem:[#allocation7] sm:$0xff]  ;;  %v486_v33 = vld [vmem:[#allocation5 + $0xd8] sm:$0xff]  ;;  %p1707_p2 = por %p1706_p1, %p1705_p12 }
  0xa8   : > { %1334 = vmatpush3.bf16.msra.mxu0 %v1333_v13  ;;  %562 = vmatprep.mubr.f32.mxu0 %v452_v25  ;;  %v468_v28 = vld [vmem:[#allocation5 + $0x48] sm:$0xff]  ;;  %v589_v35 = vld [vmem:[#allocation7 + $0x10] sm:$0xff]  ;;  %v590_v36 = vld [vmem:[#allocation7 + $0x18] sm:$0xff]  ;;  %v1347_v41 = vpack.c.bf16 %v486_v33, %v485_v30  ;;  %p1701_p7 = pneg %p1700_p5 }
  0xa9   : > { %1336 = vmatprep.subr.bf16.mxu0 %v1335_v14  ;;  %v588_v32 = vld [vmem:[#allocation7 + $0x8] sm:$0xff]  ;;  %v1363_v37 = vpack.c.bf16 %v590_v36, %v589_v35  ;;  %v591_v38 = vld [vmem:[#allocation7 + $0x20] sm:$0xff]  ;;  %v1345_v40 = vpack.c.bf16 %v468_v28, %v467_v27  ;;  %v469_v42 = vld [vmem:[#allocation5 + $0x50] sm:$0xff] }
  0xaa   : > { %v1359_v34 = vpack.c.bf16 %v588_v32, %v587_v31  ;;  %v592_v39 = vld [vmem:[#allocation7 + $0x28] sm:$0xff]  ;;  %v470_v43 = vld [vmem:[#allocation5 + $0x58] sm:$0xff]  ;;  %v487_v44 = vld [vmem:[#allocation5 + $0xe0] sm:$0xff]  ;;  %p1708_p13 = pnand %p1707_p2, %p1701_p7 }
  0xab   : > { %v488_v45 = vld [vmem:[#allocation5 + $0xe8] sm:$0xff]  ;;  %v1367_v46 = vpack.c.bf16 %v592_v39, %v591_v38  ;;  %v593_v47 = vld [vmem:[#allocation7 + $0x30] sm:$0xff]  ;;  %v594_v48 = vld [vmem:[#allocation7 + $0x38] sm:$0xff]  ;;  %v1349_v49 = vpack.c.bf16 %v470_v43, %v469_v42 }
  0xac   : > { %1338 = vmatpush3.bf16.msra.mxu0 %v1337_v19  ;;  %1360 = vmatprep.subr.bf16.mxu1 %v1359_v34  ;;  %v1351_v50 = vpack.c.bf16 %v488_v45, %v487_v44  ;;  %v471_v51 = vld [vmem:[#allocation5 + $0x60] sm:$0xff]  ;;  %v472_v52 = vld [vmem:[#allocation5 + $0x68] sm:$0xff]  ;;  %v489_v53 = vld [vmem:[#allocation5 + $0xf0] sm:$0xff]  ;;  %v1371_v55 = vpack.c.bf16 %v594_v48, %v593_v47 }
  0xad   : > { %1340 = vmatprep.subr.bf16.mxu0 %v1339_v20  ;;  %1362 = vmatpush3.bf16.msra.mxu1 %v1359_v34  ;;  %v490_v54 = vld [vmem:[#allocation5 + $0xf8] sm:$0xff]  ;;  %v595_v56 = vld [vmem:[#allocation7 + $0x40] sm:$0xff]  ;;  %v596_v57 = vld [vmem:[#allocation7 + $0x48] sm:$0xff]  ;;  %v1353_v58 = vpack.c.bf16 %v472_v52, %v471_v51 }
  0xae   : > { %1364 = vmatprep.subr.bf16.mxu1 %v1363_v37  ;;  %v1355_v59 = vpack.c.bf16 %v490_v54, %v489_v53  ;;  %v473_v60 = vld [vmem:[#allocation5 + $0x70] sm:$0xff]  ;;  %v474_v61 = vld [vmem:[#allocation5 + $0x78] sm:$0xff]  ;;  %v1375_v62 = vpack.c.bf16 %v596_v57, %v595_v56  ;;  %v451_v0 = vld [vmem:[%s2109_s26] sm:$0xff] }
  0xaf   : > { %v1357_v63 = vpack.c.bf16 %v474_v61, %v473_v60  ;;  %v454_v1 = vld [vmem:[%s2109_s26 + $0x18] sm:$0xff]  ;;  %v453_v2 = vld [vmem:[%s2109_s26 + $0x10] sm:$0xff]  ;;  %v456_v3 = vld [vmem:[%s2109_s26 + $0x28] sm:$0xff] }
  0xb0   : > { %1342 = vmatpush3.bf16.msra.mxu0 %v1341_v26  ;;  %v455_v4 = vld [vmem:[%s2109_s26 + $0x20] sm:$0xff]  ;;  %v458_v5 = vld [vmem:[%s2109_s26 + $0x38] sm:$0xff]  ;;  %v457_v6 = vld [vmem:[%s2109_s26 + $0x30] sm:$0xff]  ;;  %s2154_s26 = scalar_lea.hbm %s2244_s9, %s1164_s13 }
  0xb1   : > { %1344 = vmatprep.subr.bf16.mxu0 %v1343_v29  ;;  %1366 = vmatpush3.bf16.msra.mxu1 %v1363_v37  ;;  %v597_v7 = vld [vmem:[#allocation7 + $0x50] sm:$0xff]  ;;  %v598_v8 = vld [vmem:[#allocation7 + $0x58] sm:$0xff]  ;;  %v599_v10 = vld [vmem:[#allocation7 + $0x60] sm:$0xff] }
  0xb2   : > { %1368 = vmatprep.subr.bf16.mxu1 %v1367_v46  ;;  %v1379_v9 = vpack.c.bf16 %v598_v8, %v597_v7  ;;  %v600_v11 = vld [vmem:[#allocation7 + $0x68] sm:$0xff]  ;;  %v601_v13 = vld [vmem:[#allocation7 + $0x70] sm:$0xff]  ;;  %v602_v14 = vld [vmem:[#allocation7 + $0x78] sm:$0xff] }
  0xb3   : > { %v1383_v12 = vpack.c.bf16 %v600_v11, %v599_v10  ;;  %v1387_v15 = vpack.c.bf16 %v602_v14, %v601_v13  ;;  %v699_v16 = vld [vmem:[#allocation8] sm:$0xff]  ;;  %v700_v17 = vld [vmem:[#allocation8 + $0x8] sm:$0xff]  ;;  %v701_v18 = vld [vmem:[#allocation8 + $0x10] sm:$0xff] }
  0xb4   : > { %1346 = vmatpush3.bf16.msra.mxu0 %v1345_v40  ;;  %v1391_v19 = vpack.c.bf16 %v700_v17, %v699_v16  ;;  %v702_v20 = vld [vmem:[#allocation8 + $0x18] sm:$0xff]  ;;  %v703_v22 = vld [vmem:[#allocation8 + $0x20] sm:$0xff]  ;;  %v704_v23 = vld [vmem:[#allocation8 + $0x28] sm:$0xff] }
  0xb5   : > { %1348 = vmatprep.subr.bf16.mxu0 %v1347_v41  ;;  %1370 = vmatpush3.bf16.msra.mxu1 %v1367_v46  ;;  %v1395_v21 = vpack.c.bf16 %v702_v20, %v701_v18  ;;  %v1399_v24 = vpack.c.bf16 %v704_v23, %v703_v22  ;;  %v705_v25 = vld [vmem:[#allocation8 + $0x30] sm:$0xff]  ;;  %v706_v26 = vld [vmem:[#allocation8 + $0x38] sm:$0xff]  ;;  %v707_v28 = vld [vmem:[#allocation8 + $0x40] sm:$0xff] }
  0xb6   : > { %1372 = vmatprep.subr.bf16.mxu1 %v1371_v55  ;;  %v1403_v27 = vpack.c.bf16 %v706_v26, %v705_v25  ;;  %v708_v29 = vld [vmem:[#allocation8 + $0x48] sm:$0xff]  ;;  %v709_v31 = vld [vmem:[#allocation8 + $0x50] sm:$0xff]  ;;  %v710_v32 = vld [vmem:[#allocation8 + $0x58] sm:$0xff] }
  0xb7   : > { %v1407_v30 = vpack.c.bf16 %v708_v29, %v707_v28  ;;  %v1411_v33 = vpack.c.bf16 %v710_v32, %v709_v31  ;;  %v711_v34 = vld [vmem:[#allocation8 + $0x60] sm:$0xff]  ;;  %v712_v35 = vld [vmem:[#allocation8 + $0x68] sm:$0xff]  ;;  %v817_v7 = vld [vmem:[#allocation10 + $0x30] sm:$0xff] }
  0xb8   : > { %1350 = vmatpush3.bf16.msra.mxu0 %v1349_v49  ;;  %v1415_v36 = vpack.c.bf16 %v712_v35, %v711_v34  ;;  %v1150_v39 = vld [vmem:[%s2237_s2] ss:$0 sm:$0xff]  ;;  %v812_v61 = vld [vmem:[#allocation10 + $0x8] sm:$0xff]  ;;  %v821_v13 = vld [vmem:[#allocation10 + $0x50] sm:$0xff] }
  0xb9   : > { %1352 = vmatprep.subr.bf16.mxu0 %v1351_v50  ;;  %1374 = vmatpush3.bf16.msra.mxu1 %v1371_v55  ;;  %v820_v8 = vld [vmem:[#allocation10 + $0x48] sm:$0xff]  ;;  %v823_v18 = vld [vmem:[#allocation10 + $0x60] sm:$0xff]  ;;  %v829_v25 = vld [vmem:[#allocation10 + $0x90] sm:$0xff] }
  0xba   : > { %1376 = vmatprep.subr.bf16.mxu1 %v1375_v62  ;;  %v824_v14 = vld [vmem:[#allocation10 + $0x68] sm:$0xff]  ;;  %v833_v31 = vld [vmem:[#allocation10 + $0xb0] sm:$0xff] }
  0xbb   : > { %v828_v20 = vld [vmem:[#allocation10 + $0x88] sm:$0xff] }
  0xbc   : > { %1354 = vmatpush3.bf16.msra.mxu0 %v1353_v58  ;;  %v713_v58 = vld [vmem:[#allocation8 + $0x70] sm:$0xff]  ;;  %v832_v26 = vld [vmem:[#allocation10 + $0xa8] sm:$0xff] }
  0xbd   : > { %1356 = vmatprep.subr.bf16.mxu0 %v1355_v59  ;;  %1378 = vmatpush3.bf16.msra.mxu1 %v1375_v62  ;;  %v714_v59 = vld [vmem:[#allocation8 + $0x78] sm:$0xff]  ;;  %v836_v32 = vld [vmem:[#allocation10 + $0xc8] sm:$0xff] }
  0xbe   : > { %1380 = vmatprep.subr.bf16.mxu1 %v1379_v9  ;;  %v1419_v60 = vpack.c.bf16 %v714_v59, %v713_v58  ;;  %v814_v62 = vld [vmem:[#allocation10 + $0x18] sm:$0xff] }
  0xc0   : > { %1358 = vmatpush3.bf16.msra.mxu0 %v1357_v63  ;;  %v811_v63 = vld [vmem:[#allocation10] sm:$0xff] }
  0xc1   : > { %1382 = vmatpush3.bf16.msra.mxu1 %v1379_v9  ;;  %1392 = vmatprep.subr.bf16.mxu0 %v1391_v19  ;;  %v822_v9 = vld [vmem:[#allocation10 + $0x58] sm:$0xff] }
  0xc2   : > { %1384 = vmatprep.subr.bf16.mxu1 %v1383_v12  ;;  %v1431_v11 = vpack.c.bf16 %v822_v9, %v820_v8 }
  0xc3   : > { %563 = vmatmul.mubr.f32.vlgmr.msra.gmra.mrb[0].mxu0 %v451_v0  ;;  %v1423_v0 = vpack.c.bf16 %v814_v62, %v812_v61 }
  0xc4   : > { %567 = vmatprep.mubr.f32.mxu0 %v454_v1  ;;  %1394 = vmatpush3.bf16.msra.mxu0 %v1391_v19  ;;  %v813_v1 = vld [vmem:[#allocation10 + $0x10] sm:$0xff] }
  0xc5   : > { %1386 = vmatpush3.bf16.msra.mxu1 %v1383_v12  ;;  %1396 = vmatprep.subr.bf16.mxu0 %v1395_v21  ;;  %v819_v12 = vld [vmem:[#allocation10 + $0x40] sm:$0xff]  ;;  %v825_v19 = vld [vmem:[#allocation10 + $0x70] sm:$0xff] }
  0xc6   : > { %1388 = vmatprep.subr.bf16.mxu1 %v1387_v15  ;;  %v1433_v16 = vpack.c.bf16 %v821_v13, %v819_v12  ;;  %v1437_v22 = vpack.c.bf16 %v825_v19, %v823_v18 }
  0xc7   : > { %568 = vmatmul.mubr.f32.gmra.mrb[2].mxu0 %v453_v2  ;;  %v816_v2 = vld [vmem:[#allocation10 + $0x28] sm:$0xff] }
  0xc8   : > { %572 = vmatprep.mubr.f32.mxu0 %v456_v3  ;;  %1398 = vmatpush3.bf16.msra.mxu0 %v1395_v21  ;;  %v818_v3 = vld [vmem:[#allocation10 + $0x38] sm:$0xff] }
  0xc9   : > { %1390 = vmatpush3.bf16.msra.mxu1 %v1387_v15  ;;  %1400 = vmatprep.subr.bf16.mxu0 %v1399_v24  ;;  %v826_v15 = vld [vmem:[#allocation10 + $0x78] sm:$0xff] }
  0xca   : > { %1424 = vmatprep.subr.bf16.mxu1 %v1423_v0  ;;  %v1435_v17 = vpack.c.bf16 %v826_v15, %v824_v14  ;;  %v830_v21 = vld [vmem:[#allocation10 + $0x98] sm:$0xff] }
  0xcb   : > { %573 = vmatmul.mubr.f32.gmra.mrb[4].mxu0 %v455_v4  ;;  %v1425_v4 = vpack.c.bf16 %v813_v1, %v811_v63  ;;  %v1439_v23 = vpack.c.bf16 %v830_v21, %v828_v20 }
  0xcc   : > { %577 = vmatprep.mubr.f32.mxu0 %v458_v5  ;;  %1402 = vmatpush3.bf16.msra.mxu0 %v1399_v24  ;;  %v1427_v5 = vpack.c.bf16 %v818_v3, %v816_v2  ;;  %v827_v24 = vld [vmem:[#allocation10 + $0x80] sm:$0xff] }
  0xcd   : > { %1404 = vmatprep.subr.bf16.mxu0 %v1403_v27  ;;  %v1441_v28 = vpack.c.bf16 %v829_v25, %v827_v24 }
  0xcf   : > { %578 = vmatmul.mubr.f32.gmra.mrb[6].mxu0 %v457_v6  ;;  %v815_v6 = vld [vmem:[#allocation10 + $0x20] sm:$0xff] }
  0xd0   : > { %1406 = vmatpush3.bf16.msra.mxu0 %v1403_v27  ;;  %v1429_v10 = vpack.c.bf16 %v817_v7, %v815_v6  ;;  %v834_v27 = vld [vmem:[#allocation10 + $0xb8] sm:$0xff] }
  0xd1   : > { %1408 = vmatprep.subr.bf16.mxu0 %v1407_v30  ;;  %v1443_v29 = vpack.c.bf16 %v834_v27, %v832_v26 }
  0xd4   : > { %1410 = vmatpush3.bf16.msra.mxu0 %v1407_v30  ;;  %v831_v30 = vld [vmem:[#allocation10 + $0xa0] sm:$0xff] }
  0xd5   : > { %1412 = vmatprep.subr.bf16.mxu0 %v1411_v33  ;;  %v1445_v34 = vpack.c.bf16 %v833_v31, %v831_v30 }
  0xd8   : > { %1414 = vmatpush3.bf16.msra.mxu0 %v1411_v33  ;;  %v838_v33 = vld [vmem:[#allocation10 + $0xd8] sm:$0xff] }
  0xd9   : > { %1416 = vmatprep.subr.bf16.mxu0 %v1415_v36  ;;  %v1447_v35 = vpack.c.bf16 %v838_v33, %v836_v32 }
  0xdc   : > { %1418 = vmatpush3.bf16.msra.mxu0 %v1415_v36  ;;  %v835_v36 = vld [vmem:[#allocation10 + $0xc0] sm:$0xff] }
  0xdd   : > { %1420 = vmatprep.subr.bf16.mxu0 %v1419_v60 }
  0xe0   : > { %1422 = vmatpush3.bf16.msra.mxu0 %v1419_v60 }
 0x196   : > { %v1199_v37 = vpop.f32.mrb[0].mxu0 }
 0x197   : > { %v1200_v38 = vpop.f32.mrb[1].mxu0 }
 0x198   : > { %v1201_v40 = vadd.f32 %v1200_v38, %v1199_v37  ;;  %v837_v37 = vld [vmem:[#allocation10 + $0xd0] sm:$0xff] }
 0x199   : > { %v1449_v38 = vpack.c.bf16 %v837_v37, %v835_v36 }
 0x19a   : > { %v1202_v41 = vpop.f32.mrb[2].mxu0  ;;  %v565_v42 = vadd.f32 %v1201_v40, %v1150_v39 }
 0x19b   : > { %v1203_v43 = vpop.f32.mrb[3].mxu0 }
 0x19c   : > { %v1204_v44 = vadd.f32 %v1203_v43, %v1202_v41  ;;  %v583_v45 = vmax.f32 %v565_v42, 0.0 }
 0x19e   : > { %v570_v46 = vadd.f32 %v1204_v44, %v1150_v39  ;;  %v1205_v47 = vpop.f32.mrb[4].mxu0  ;;  %1283 = vmatprep.mubr.f32.mxu1 %v583_v45 }
 0x19f   : > { %v1206_v48 = vpop.f32.mrb[5].mxu0 }
 0x1a0   : > { %v584_v49 = vmax.f32 %v570_v46, 0.0  ;;  %v1207_v50 = vadd.f32 %v1206_v48, %v1205_v47  ;;  %v840_v48 = vld [vmem:[#allocation10 + $0xe8] sm:$0xff] }
 0x1a2   : > { %v575_v51 = vadd.f32 %v1207_v50, %v1150_v39  ;;  %v1208_v52 = vpop.f32.mrb[6].mxu0  ;;  %1284 = vmatmul.mubr.f32.vlgmr.msra.gmra.mrb[0].mxu1 %v584_v49  ;;  %v842_v49 = vld [vmem:[#allocation10 + $0xf8] sm:$0xff] }
 0x1a3   : > { %v1209_v53 = vpop.f32.mrb[7].mxu0  ;;  %1426 = vmatpush1.bf16.msra.mxu1 %v1425_v4  ;;  %v1451_v50 = vpack.c.bf16 %v842_v49, %v840_v48 }
 0x1a4   : > { %v585_v54 = vmax.f32 %v575_v51, 0.0  ;;  %v1210_v55 = vadd.f32 %v1209_v53, %v1208_v52  ;;  %1428 = vmatprep.subr.bf16.mxu1 %v1427_v5  ;;  %v839_v51 = vld [vmem:[#allocation10 + $0xe0] sm:$0xff]  ;;  %v841_v52 = vld [vmem:[#allocation10 + $0xf0] sm:$0xff] }
 0x1a5   : > { %v1453_v53 = vpack.c.bf16 %v841_v52, %v839_v51 }
 0x1a6   : > { %v580_v56 = vadd.f32 %v1210_v55, %v1150_v39  ;;  %1286 = vmatprep.mubr.f32.mxu1 %v585_v54  ;;  %v1151_v39 = vld [vmem:[%s2239_s4] ss:$0 sm:$0xff]  ;;  %v1815_v54 = vmov 0.0  }
 0x1a7   : > { %1430 = vmatpush1.bf16.msra.mxu1 %v1429_v10  ;;  %v1152_v55 = vld [vmem:[%s2241_s6] ss:$0 sm:$0xff] }
 0x1a8   : > { %v586_v57 = vmax.f32 %v580_v56, 0.0  ;;  %1432 = vmatprep.subr.bf16.mxu1 %v1431_v11 }
 0x1aa   : > { %1287 = vmatmul.mubr.f32.gmra.mrb[2].mxu1 %v586_v57 }
 0x1ab   : > { %1434 = vmatpush1.bf16.msra.mxu1 %v1433_v16  ;;  %919 = vmatprep.mubr.f32.mxu1 %v1815_v54 }
 0x1ac   : > { %1436 = vmatprep.subr.bf16.mxu1 %v1435_v17 }
 0x1af   : > { %1438 = vmatpush1.bf16.msra.mxu1 %v1437_v22 }
 0x1b0   : > { %1440 = vmatprep.subr.bf16.mxu1 %v1439_v23 }
 0x1b3   : > { %1442 = vmatpush1.bf16.msra.mxu1 %v1441_v28 }
 0x1b4   : > { %1444 = vmatprep.subr.bf16.mxu1 %v1443_v29 }
 0x1b7   : > { %1446 = vmatpush1.bf16.msra.mxu1 %v1445_v34 }
 0x1b8   : > { %1448 = vmatprep.subr.bf16.mxu1 %v1447_v35 }
 0x1bb   : > { %1450 = vmatpush1.bf16.msra.mxu1 %v1449_v38 }
 0x1bc   : > { %1452 = vmatprep.subr.bf16.mxu1 %v1451_v50 }
 0x1bf   : > { %1454 = vmatpush1.bf16.msra.mxu1 %v1453_v53 }
 0x275   : > { %v1285_v40 = vpop.f32.mrb[0].mxu1 }
 0x276   : > { %v682_v41 = vadd.f32 %v1285_v40, %v1151_v39  ;;  %v676_v42 = vpop.f32.mrb[1].mxu1 }
 0x277   : > { %v677_v43 = vadd.f32 %v1151_v39, %v676_v42 }
 0x278   : > { %696 = vst [vmem:[%s2138_s11 + $0x8] sm:$0xff] %v682_v41 }
 0x279   : > { %695 = vst [vmem:[%s2138_s11] sm:$0xff] %v677_v43  ;;  %1321 = vmatprep.mubr.f32.mxu0 %v677_v43 }
 0x27a   : > { %1322 = vmatmul.mubr.f32.vlgmr.msra.gmra.mrb[8].mxu0 %v682_v41 }
 0x27d   : > { %v1288_v44 = vpop.f32.mrb[2].mxu1 }
 0x27e   : > { %v692_v45 = vadd.f32 %v1288_v44, %v1151_v39  ;;  %v686_v46 = vpop.f32.mrb[3].mxu1 }
 0x27f   : > { %v687_v47 = vadd.f32 %v1151_v39, %v686_v46 }
 0x280   : > { %698 = vst [vmem:[%s2138_s11 + $0x18] sm:$0xff] %v692_v45 }
 0x281   : > { %697 = vst [vmem:[%s2138_s11 + $0x10] sm:$0xff] %v687_v47  ;;  %1324 = vmatprep.mubr.f32.mxu0 %v687_v47 }
 0x282   : > { %1325 = vmatmul.mubr.f32.gmra.mrb[10].mxu0 %v692_v45 }
 0x34d   : > { %v1323_v56 = vpop.f32.mrb[8].mxu0 }
 0x34e   : > { %v788_v57 = vpop.f32.mrb[9].mxu0  ;;  %v794_v59 = vadd.f32 %v1323_v56, %v1152_v55 }
 0x34f   : > { %v789_v58 = vadd.f32 %v1152_v55, %v788_v57 }
 0x350   : > { %v808_v61 = vmax.f32 %v794_v59, 0.0 }
 0x351   : > { %v807_v60 = vmax.f32 %v789_v58, 0.0 }
 0x353   : > { %920 = vmatmul.mubr.f32.vlgmr.msra.gmra.mrb[4].mxu1 %v807_v60 }
 0x354   : > { %925 = vmatprep.mubr.f32.mxu1 %v1815_v54 }
 0x355   : > { %v1326_v62 = vpop.f32.mrb[10].mxu0 }
 0x356   : > { %v798_v63 = vpop.f32.mrb[11].mxu0  ;;  %v804_v1 = vadd.f32 %v1326_v62, %v1152_v55 }
 0x357   : > { %v799_v0 = vadd.f32 %v1152_v55, %v798_v63  ;;  %926 = vmatmul.mubr.f32.gmra.mrb[6].mxu1 %v808_v61 }
 0x358   : > { %931 = vmatprep.mubr.f32.mxu1 %v1815_v54  ;;  %v810_v3 = vmax.f32 %v804_v1, 0.0 }
 0x359   : > { %v809_v2 = vmax.f32 %v799_v0, 0.0 }
 0x35b   : > { %932 = vmatmul.mubr.f32.gmra.mrb[8].mxu1 %v809_v2 }
 0x35c   : > { %937 = vmatprep.mubr.f32.mxu1 %v1815_v54 }
 0x35f   : > { %938 = vmatmul.mubr.f32.gmra.mrb[10].mxu1 %v810_v3 }
 0x360   : > { %1711 = shalt.err (!%p1708_p13)
}
 0x361   : > { %s1712_s11 = scalar_lea.hbm %s2154_s26, 512  ;;  %s1716_s13 = scalar_lea.hbm %s2244_s9, 1024 }
 0x362   : > { %p1713_p9 = scmp.ne.s32.totalorder %s2154_s26, %s1712_s11  ;;  %p1717_p4 = scmp.lt.u32.totalorder %s2154_s26, %s2244_s9 }
 0x363   : > { %p1718_p8 = scmp.lt.u32.totalorder %s1716_s13, %s1712_s11  ;;  %p1720_p10 = scmp.lt.u32.totalorder %s1712_s11, %s2154_s26 }
 0x364   : > { %p1714_p0 = pnand %p1713_p9, %p2051_p3 }
 0x365   : > { %p1719_p6 = por %p1718_p8, %p1717_p4 }
 0x366   : > { %p1715_p11 = pneg %p1714_p0 }
 0x367   : > { %p1721_p5 = por %p1720_p10, %p1719_p6 }
 0x369   : > { %p1722_p7 = pnand %p1721_p5, %p1715_p11 }
 0x36b   : > { %1725 = shalt.err (!%p1722_p7)
}
 0x36c   : > { %s1817_s21 = smov 128   ;;  %s1818_s30 = smov 8   ;;  %v845_v4 = vlaneseq }
 0x36d   : > { %1473 = dma.vmem_to_hbm [thread:$0]  (%p2051_p3), %s2148_s25, 512, %s2154_s26, %s953_s19, %s1817_s21, %s1817_s21, %s1818_s30  }
 0x36e   : > { %v846_v5 = vshrl.u32 %v845_v4, 7  ;;  %s2270_s10 = sld [smem:[#allocation21_spill]]  ;;  %s447_s11 = scalar_lea.vmem [#allocation12], %s1143_s27 }
 0x36f   : > { %s988_s25 = sshll.u32 %s447_s11, 4  ;;  %s1166_s26 = sshll.u32 %s1898_s17, 10  ;;  %s2186_s25 = int_to_ptr.vmem [resolvable:$true] %s988_s25 }
 0x370   : > { %v847_v6 = vsub.s32 0, %v846_v5  ;;  %v851_v8 = vsub.s32 1, %v846_v5  ;;  %s2271_s18 = sld [smem:[#allocation22_spill]]  ;;  %s958_s29 = scalar_lea.sflag [#allocation13], %s2103_s20 }
 0x371   : > { %s1726_s17 = scalar_lea.vmem %s2186_s25, 1024  ;;  %s1819_s28 = smov [#allocation12]  }
 0x372   : > { %p1727_p12 = scmp.ne.s32.totalorder %s2186_s25, %s1726_s17  ;;  %s1730_s21 = sshll.u32 %s1819_s28, 4  ;;  %s1731_s21 = int_to_ptr.vmem [resolvable:$false] %s1730_s21 }
 0x373   : > { %s1732_s30 = scalar_lea.vmem %s1731_s21, 2048  ;;  %p1733_p13 = scmp.lt.s32.totalorder %s2186_s25, %s1731_s21 }
 0x374   : > { %v843_v7 = vld [vmem:[%s2270_s10] sm:$0x3]  ;;  %p1728_p1 = pnand %p1727_p12, %p2051_p3  ;;  %p1734_p9 = scmp.lt.s32.totalorder %s1732_s30, %s1726_s17 }
 0x375   : > { %v848_v9 = vrot.slane %v843_v7, %v847_v6  ;;  %v852_v10 = vrot.slane %v843_v7, %v851_v8 }
 0x376   : > { %s2191_s13 = scalar_lea.hbm %s2271_s18, %s1166_s26  ;;  %p1729_p2 = pneg %p1728_p1 }
 0x377   : > { %p1735_p0 = por %p1734_p9, %p1733_p13 }
 0x379   : > { %p1736_p11 = pnand %p1735_p0, %p1729_p2 }
 0x426   : > { %v921_v11 = vpop.f32.mrb[4].mxu1 }
 0x427   : > { %v922_v12 = vadd.f32 %v921_v11, %v848_v9  ;;  %v923_v13 = vpop.f32.mrb[5].mxu1 }
 0x428   : > { %v924_v14 = vadd.f32 %v923_v13, %v852_v10 }
 0x429   : > { %944 = vst [vmem:[%s447_s11] sm:$0xff] %v922_v12 }
 0x42a   : > { %945 = vst [vmem:[%s447_s11 + $0x8] sm:$0xff] %v924_v14  ;;  %v927_v15 = vpop.f32.mrb[6].mxu1 }
 0x42b   : > { %v928_v16 = vadd.f32 %v927_v15, %v848_v9  ;;  %v929_v17 = vpop.f32.mrb[7].mxu1 }
 0x42c   : > { %v930_v18 = vadd.f32 %v929_v17, %v852_v10 }
 0x42d   : > { %946 = vst [vmem:[%s447_s11 + $0x10] sm:$0xff] %v928_v16 }
 0x42e   : > { %947 = vst [vmem:[%s447_s11 + $0x18] sm:$0xff] %v930_v18  ;;  %v933_v19 = vpop.f32.mrb[8].mxu1 }
 0x42f   : > { %v934_v20 = vadd.f32 %v933_v19, %v848_v9  ;;  %v935_v21 = vpop.f32.mrb[9].mxu1 }
 0x430   : > { %v936_v22 = vadd.f32 %v935_v21, %v852_v10 }
 0x431   : > { %948 = vst [vmem:[%s447_s11 + $0x20] sm:$0xff] %v934_v20 }
 0x432   : > { %949 = vst [vmem:[%s447_s11 + $0x28] sm:$0xff] %v936_v22  ;;  %v939_v23 = vpop.f32.mrb[10].mxu1 }
 0x433   : > { %v940_v24 = vadd.f32 %v939_v23, %v848_v9  ;;  %v941_v25 = vpop.f32.mrb[11].mxu1 }
 0x434   : > { %v942_v26 = vadd.f32 %v941_v25, %v852_v10 }
 0x435   : > { %950 = vst [vmem:[%s447_s11 + $0x30] sm:$0xff] %v940_v24 }
 0x436   : > { %951 = vst [vmem:[%s447_s11 + $0x38] sm:$0xff] %v942_v26 }
 0x437   : > { %1739 = shalt.err (!%p1736_p11)
}
 0x438   : > { %s1740_s22 = scalar_lea.hbm %s2191_s13, 1024  ;;  %s1744_s11 = scalar_lea.hbm %s2271_s18, 2048 }
 0x439   : > { %p1741_p4 = scmp.ne.s32.totalorder %s2191_s13, %s1740_s22  ;;  %p1745_p10 = scmp.lt.u32.totalorder %s2191_s13, %s2271_s18 }
 0x43a   : > { %p1746_p5 = scmp.lt.u32.totalorder %s1744_s11, %s1740_s22  ;;  %p1748_p12 = scmp.lt.u32.totalorder %s1740_s22, %s2191_s13 }
 0x43b   : > { %p1742_p8 = pnand %p1741_p4, %p2051_p3 }
 0x43c   : > { %p1747_p7 = por %p1746_p5, %p1745_p10 }
 0x43d   : > { %p1743_p6 = pneg %p1742_p8 }
 0x43e   : > { %p1749_p1 = por %p1748_p12, %p1747_p7 }
 0x440   : > { %p1750_p2 = pnand %p1749_p1, %p1743_p6 }
 0x442   : > { %1753 = shalt.err (!%p1750_p2)
}
 0x443   : > { %s1820_s19 = smov 256   ;;  %s1821_s17 = smov 16  }
 0x444   : > { %1474 = dma.vmem_to_hbm [thread:$0]  (%p2051_p3), %s2186_s25, 1024, %s2191_s13, %s958_s29, %s1820_s19, %s1820_s19, %s1821_s17  }
 0x445 PF: > { %s2272_s28 = sld [smem:[#allocation19_spill]]  ;;  %s2273_s21 = sld [smem:[#allocation20_spill]] }
 0x446   : > { %p2275_p9 = scmp.ge.s32.totalorder %s1804_s16, 2 }
 0x44b   : > { %s1003_s30 = sand.u32 1, %s2272_s28   ;;  %p2274_p13 = scmp.ne.s32.totalorder %s2273_s21, 0 }
 0x44c   : > { %s1004_s22 = scalar_lea.sflag [#allocation4], %s1003_s30 }
 0x44d   : > { %p1495_p0 = pnand %p2275_p9, %p2274_p13 }
 0x44f   : > { %1783 = dma.done.wait (!%p1495_p0), %s1004_s22, 512  }
 0x450   : > { %1785 = vsyncadd (!%p1495_p0), %s1004_s22, 4294966784  ;;  %s1013_s23 = scalar_lea.sflag [#allocation13], %s1003_s30 }
 0x451   : > { %1787 = dma.done.wait (!%p1495_p0), %s1013_s23, 1024  }
 0x452   : > { %1789 = vsyncadd (!%p1495_p0), %s1013_s23, 4294966272  ;;  %p29_p3 = scmp.ge.s32.totalorder %s2038_s8, 4   ;;  %s2276_s13 = smov %s1796_s14 }
 0x453   : > { %s2277_s14 = smov %s1800_s15  ;;  %s2278_s15 = smov %s2047_s12 }
 0x454   : > { %s2279_s16 = smov %s2038_s8  ;;  %31 = sbr.rel (!%p29_p3) target bundleno = 12 (0xc), region = 134 }
 0x45b   :  { %1018 = vsyncpa [#allocation3], 1 }
 0x45c   :  { %1020 = vsyncpa [#allocation3 + $0x1], 1 }
 0x45d   :  { %1021 = vsyncpa [#allocation6], 1 }
 0x45e   :  { %1022 = vsyncpa [#allocation9], 1 }
 0x45f   :  { %1023 = vsyncpa [#allocation4], 1 }
 0x460   :  { %1025 = vsyncpa [#allocation4 + $0x1], 1 }
 0x461   :  { %1026 = vsyncpa [#allocation13], 1 }
 0x462   :  { %1028 = vsyncpa [#allocation13 + $0x1], 1 }

</bundles_post_ra>
